<compile_context>
chip_gen: v5e
topology: v5e:2x2
jax: 0.10.0
libtpu: 0.0.40
codegen_flags: <defaults>
</compile_context>

<pallas_src>
import jax
import jax.numpy as jnp
from jax.experimental import pallas as pl
from jax.experimental.pallas import tpu as pltpu


_LANES = 256  # lane-dense last dim (multiple of 128) -> unmasked full-tile vst


def _residual_add_kernel(m_ref, s_ref, o_ref):
    # Promote / cast inside the kernel so mixed-dtype inputs are read from HBM
    # at their native (possibly narrower) width.  Single full-tile store.
    o_ref[...] = (m_ref[...] + s_ref[...]).astype(o_ref.dtype)


def _round_up(x, m):
    return ((x + m - 1) // m) * m


def _sublane_req(dtype):
    # Minimum sublane multiple per dtype: 8 for 32-bit, 16 for bf16/f16,
    # 32 for int8/fp8 (sub-32-bit dtypes pack along sublanes).
    return max(8, 32 // jnp.dtype(dtype).itemsize)


def _tpu_vmem_capacity_bytes():
    try:
        info = pltpu.get_tpu_info()
        cap = getattr(info, "vmem_capacity_bytes", None)
        if cap:
            return int(cap)
    except Exception:
        pass
    return 64 * 1024 * 1024  # conservative fallback (v7x-sized VMEM)


def _plan_tiling(n, dtypes):
    """Pick (rows_pad, n_pad, tile_rows, grid, vmem_limit) for a flat add."""
    sublane = max(_sublane_req(d) for d in dtypes)
    rows = pl.cdiv(n, _LANES)
    rows_pad = _round_up(rows, sublane)   # pad rows only to the sublane req
    n_pad = rows_pad * _LANES

    vmem_cap = _tpu_vmem_capacity_bytes()
    small_vmem = vmem_cap <= 64 * 1024 * 1024        # v7x: 64 MiB/TC, 2 TCs
    vmem_limit = (48 if small_vmem else 64) * 1024 * 1024

    itemsizes = [jnp.dtype(d).itemsize for d in dtypes]
    sum_items = sum(itemsizes)
    max_item = max(itemsizes)

    # 3 refs x 2 pipeline buffers must fit comfortably under the scoped limit.
    budget = (vmem_limit * 3) // 4
    tb = budget // (2 * _LANES * sum_items)
    # Per-ref tile cap: ~4 MiB on v7x (less VMEM, faster HBM), ~8 MiB otherwise.
    per_ref_cap = (4 if small_vmem else 8) * 1024 * 1024
    tb = min(tb, per_ref_cap // (_LANES * max_item))
    tb = min(tb, rows_pad)

    # On v7x make sure the "parallel" grid axis has >= 2 steps so both
    # TensorCores get fed.
    if small_vmem and rows_pad >= 2 * sublane and tb >= rows_pad:
        tb = _round_up(pl.cdiv(rows_pad, 2), sublane)

    tb = max(sublane, (tb // sublane) * sublane)
    grid = pl.cdiv(rows_pad, tb)
    return rows_pad, n_pad, tb, grid, vmem_limit


def residual_add(main_out, skip_out):
    """ResidualBlock forward combine: main(x) + skip(x), as a Pallas kernel."""
    assert main_out.shape == skip_out.shape, "main(x) and skip(x) shapes must match"
    out_dtype = jnp.promote_types(main_out.dtype, skip_out.dtype)
    orig_shape = main_out.shape
    n = int(main_out.size)

    dtypes = (main_out.dtype, skip_out.dtype, out_dtype)
    rows_pad, n_pad, tb, grid, vmem_limit = _plan_tiling(n, dtypes)

    def to_slab(a):
        a = a.reshape(-1)                 # keep native dtype; no wrapper astype
        if n_pad != n:
            a = jnp.pad(a, (0, n_pad - n))
        return a.reshape(rows_pad, _LANES)

    m2 = to_slab(main_out)
    s2 = to_slab(skip_out)

    bytes_accessed = n * (jnp.dtype(main_out.dtype).itemsize
                          + jnp.dtype(skip_out.dtype).itemsize
                          + jnp.dtype(out_dtype).itemsize)

    out = pl.pallas_call(
        _residual_add_kernel,
        out_shape=jax.ShapeDtypeStruct((rows_pad, _LANES), out_dtype),
        grid_spec=pltpu.PrefetchScalarGridSpec(
            num_scalar_prefetch=0,
            grid=(grid,),
            in_specs=[pl.BlockSpec((tb, _LANES), lambda i: (i, 0)),
                      pl.BlockSpec((tb, _LANES), lambda i: (i, 0))],
            out_specs=pl.BlockSpec((tb, _LANES), lambda i: (i, 0)),
        ),
        compiler_params=pltpu.CompilerParams(
            dimension_semantics=("parallel",),   # megacore sharding on v7x
            vmem_limit_bytes=vmem_limit,
        ),
        cost_estimate=pl.CostEstimate(
            flops=n, transcendentals=0, bytes_accessed=bytes_accessed),
    )(m2, s2)

    if n_pad == n:
        return out.reshape(orig_shape)       # no trailing slice/copy
    return out.reshape(-1)[:n].reshape(orig_shape)


class ResidualBlock:
    """forward(x) = main(x) + skip(x); the combine runs in a Pallas kernel."""

    def __init__(self, main, skip=None):
        # TODO(synk): arbitrary nn.Sequential children have no generic Pallas
        # translation; they run as plain JAX callables and only the residual
        # combine (this module's own forward) is lowered to a Pallas kernel.
        self.main = list(main)
        self.skip = skip

    def __call__(self, x):
        h = x
        for layer in self.main:
            h = layer(h)
        s = x if self.skip is None else self.skip(x)
        return residual_add(h, s)


if __name__ == "__main__":
    key = jax.random.PRNGKey(0)
    k1, k2, k3, k4, kx = jax.random.split(key, 5)

    B, C, H, W = 2, 4, 16, 16
    hidden = 8

    # Example `main`: 1x1 conv (channel linear) -> ReLU -> 1x1 conv; skip = Identity.
    w1 = jax.random.normal(k1, (hidden, C), jnp.float32) * 0.1
    b1 = jax.random.normal(k2, (hidden,), jnp.float32) * 0.1
    w2 = jax.random.normal(k3, (C, hidden), jnp.float32) * 0.1
    b2 = jax.random.normal(k4, (C,), jnp.float32) * 0.1
    x = jax.random.normal(kx, (B, C, H, W), jnp.float32)

    def conv1x1(w, b):
        return lambda t: jnp.einsum("oc,bchw->bohw", w, t) + b[None, :, None, None]

    def relu(t):
        return jnp.maximum(t, 0.0)

    block = ResidualBlock(main=[conv1x1(w1, b1), relu, conv1x1(w2, b2)], skip=None)

    out = jax.block_until_ready(block(x))

    # Pure-JAX reference of the same forward: main(x) + skip(x).
    h = conv1x1(w1, b1)(x)
    h = relu(h)
    h = conv1x1(w2, b2)(h)
    ref = h + x

    assert out.shape == ref.shape == (B, C, H, W)
    assert jnp.allclose(out, ref, atol=1e-5, rtol=1e-5), "mismatch vs reference"

    print("KERNEL_OK")
</pallas_src>

<mosaic_0001>
module attributes {stable_mosaic.version = 11 : i64} {
  func.func @_residual_add_kernel(%arg0: i32, %arg1: memref<8x256xf32, #tpu.memory_space<vmem>>, %arg2: memref<8x256xf32, #tpu.memory_space<vmem>>, %arg3: memref<8x256xf32, #tpu.memory_space<vmem>>) attributes {dimension_semantics = [#tpu.dimension_semantics<parallel>], iteration_bounds = array<i64: 1>, scalar_prefetch = 0 : i64, scratch_operands = 0 : i64, tpu.core_type = #tpu.core_type<tc>, window_params = [{transform_indices = @transform_0, window_bounds = array<i64: 8, 256>}, {transform_indices = @transform_1, window_bounds = array<i64: 8, 256>}, {transform_indices = @transform_2, window_bounds = array<i64: 8, 256>}]} {
    %c0 = arith.constant 0 : index
    %c0_0 = arith.constant 0 : index
    %0 = vector.load %arg1[%c0, %c0_0] : memref<8x256xf32, #tpu.memory_space<vmem>>, vector<8x256xf32>
    %c0_1 = arith.constant 0 : index
    %c0_2 = arith.constant 0 : index
    %1 = vector.load %arg2[%c0_1, %c0_2] : memref<8x256xf32, #tpu.memory_space<vmem>>, vector<8x256xf32>
    %2 = arith.addf %0, %1 : vector<8x256xf32>
    %c0_3 = arith.constant 0 : index
    %c0_4 = arith.constant 0 : index
    %3 = vector.load %arg3[%c0_3, %c0_4] : memref<8x256xf32, #tpu.memory_space<vmem>>, vector<8x256xf32>
    tpu.vector_store %arg3[%c0_3, %c0_4], %2 {strides = array<i32>} : memref<8x256xf32, #tpu.memory_space<vmem>>, vector<8x256xf32>,
    return
  }
  func.func @transform_0(%arg0: i32) -> (i32, i32) {
    %c0_i32 = arith.constant 0 : i32
    %c0_i32_0 = arith.constant 0 : i32
    return %arg0, %c0_i32 : i32, i32
  }
  func.func @transform_1(%arg0: i32) -> (i32, i32) {
    %c0_i32 = arith.constant 0 : i32
    %c0_i32_0 = arith.constant 0 : i32
    return %arg0, %c0_i32 : i32, i32
  }
  func.func @transform_2(%arg0: i32) -> (i32, i32) {
    %c0_i32 = arith.constant 0 : i32
    %c0_i32_0 = arith.constant 0 : i32
    return %arg0, %c0_i32 : i32, i32
  }
}

</mosaic_0001>

<bundles_post_ra>
// kernel: tpu_custom_call.1
= control target key start
LH: loop header
LB: loop body
LE: loop exit
PB: predicated region body
PF: predicated region fallthrough
CT: control target
= control target key end

     0   :  { %7 = vsyncpa [#allocation3], 0  ;;  %s174_s0 = inlined_call_operand.hbm [shape: f32[8,256], index: 0, kind: input, shape index: {}]   ;;  %s175_s1 = inlined_call_operand.hbm [shape: f32[8,256], index: 1, kind: input, shape index: {}]   ;;  %s176_s2 = inlined_call_operand.hbm [shape: f32[8,256], index: 2, kind: output, shape index: {}]  }
   0x1   :  { %8 = vsyncpa [#allocation6], 0 }
   0x2   :  { %9 = vsyncpa [#allocation4], 0  ;;  %s15_s11 = sshll.u32 %s174_s0, 4  ;;  %s147_s12 = smov [#allocation2]   ;;  %s16_s11 = int_to_ptr.hbm [resolvable:$true] %s15_s11 }
   0x3   :  { %s17_s13 = sshll.u32 %s147_s12, 4  ;;  %s26_s16 = sshll.u32 %s175_s1, 4  ;;  %s18_s13 = int_to_ptr.vmem [resolvable:$true] %s17_s13  ;;  %s27_s16 = int_to_ptr.hbm [resolvable:$true] %s26_s16 }
   0x4   :  { %20 = dma.hbm_to_vmem [thread:$0]  %s16_s11, 256, %s18_s13, [#allocation3]  }
   0x5   :  { %s148_s17 = smov [#allocation5]  }
   0x6   :  { %s28_s18 = sshll.u32 %s148_s17, 4  ;;  %s29_s18 = int_to_ptr.vmem [resolvable:$true] %s28_s18 }
   0x7   :  { %31 = dma.hbm_to_vmem [thread:$0]  %s27_s16, 256, %s29_s18, [#allocation6]  }
   0x8   :  { %141 = dma.done.wait [#allocation3], 256  }
   0x9   :  { %142 = vsyncadd [#allocation3], 4294967040 }
   0xa   :  { %143 = dma.done.wait [#allocation6], 256  }
   0xb   :  { %144 = vsyncadd [#allocation6], 4294967040  ;;  %s149_s19 = smov [#allocation7]   ;;  %s55_s22 = sshll.u32 %s176_s2, 4  ;;  %v40_v0 = vld [vmem:[#allocation2] sm:$0xff]  ;;  %v42_v1 = vld [vmem:[#allocation5] sm:$0xff]  ;;  %s56_s22 = int_to_ptr.hbm [resolvable:$true] %s55_s22 }
   0xc   :  { %s53_s0 = sshll.u32 %s149_s19, 4  ;;  %v41_v2 = vld [vmem:[#allocation2 + $0x8] sm:$0xff]  ;;  %v44_v3 = vadd.f32 %v42_v1, %v40_v0  ;;  %v43_v4 = vld [vmem:[#allocation5 + $0x8] sm:$0xff]  ;;  %s54_s0 = int_to_ptr.vmem [resolvable:$true] %s53_s0 }
   0xd   :  { %v45_v5 = vadd.f32 %v43_v4, %v41_v2 }
   0xe   :  { %46 = vst [vmem:[#allocation7] sm:$0xff] %v44_v3 }
   0xf   :  { %47 = vst [vmem:[#allocation7 + $0x8] sm:$0xff] %v45_v5 }
  0x10   :  { %58 = dma.vmem_to_hbm [thread:$0]  %s54_s0, 256, %s56_s22, [#allocation4]  }
  0x11   :  { %145 = dma.done.wait [#allocation4], 256  }
  0x12   :  { %146 = vsyncadd [#allocation4], 4294967040 }
  0x13   :  { %63 = vsyncpa [#allocation3], 1 }
  0x14   :  { %64 = vsyncpa [#allocation6], 1 }
  0x15   :  { %65 = vsyncpa [#allocation4], 1 }

</bundles_post_ra>
